<compile_context>
chip_gen: v5e
topology: v5e:2x2
jax: 0.10.0
libtpu: 0.0.40
codegen_flags: <defaults>
</compile_context>

<pallas_src>
import functools

import jax
import jax.numpy as jnp
from jax.experimental import pallas as pl
from jax.experimental.pallas import tpu as pltpu

_LANE = 128
_MXU_ROWS = 128
_MIB = 1024 * 1024


def _round_up(x, m):
    return (x + m - 1) // m * m


# ---------------------------------------------------------------------------
# Kernels
# ---------------------------------------------------------------------------

def _generator_kernel(x_ref, w_ref, b_ref, scores_ref, probs_ref, pred_ref):
    """Fast path: the full (D, V) weight is resident in VMEM.

    x_ref: (tm, D), w_ref: (D, V), b_ref: (1, V) f32.
    """
    # Operands hit the MXU in their native dtype (bf16 stays bf16); f32 acc.
    logits = jnp.dot(x_ref[...], w_ref[...], preferred_element_type=jnp.float32)
    logits = logits + b_ref[...]                                 # (tm, V) f32

    # argmax over raw logits: same ordering as softmax, tie-consistent, and
    # independent of the exp/reciprocal chain (XLU overlaps EUP/VPU work).
    preds = jnp.argmax(logits, axis=-1, keepdims=True).astype(jnp.int32)

    # Numerically-stable log-softmax / softmax with a SINGLE exp pass.
    m = jnp.max(logits, axis=-1, keepdims=True)
    shifted = logits - m
    e = jnp.exp(shifted)
    s = jnp.sum(e, axis=-1, keepdims=True)
    scores_ref[...] = (shifted - jnp.log(s)).astype(scores_ref.dtype)
    probs_ref[...] = (e * pl.reciprocal(s, approx=False)).astype(probs_ref.dtype)
    # Lane-dense prediction store; the wrapper keeps column 0.
    pred_ref[...] = jnp.broadcast_to(preds, pred_ref.shape)


def _generator_vtiled_kernel(x_ref, w_ref, b_ref,
                             scores_ref, probs_ref, pred_ref,
                             m_sc, s_sc, bestv_sc, besti_sc,
                             *, vocab, tv):
    """Vocab-tiled two-pass path (large V / 64 MiB-VMEM chips like v7x).

    grid = (row tiles, pass in {0, 1}, vocab tiles).
      pass 0: online running max / sum(exp) / argmax across vocab tiles.
      pass 1: recompute the logits tile, emit scores / probs / predictions.
    Output index maps send all pass-0 steps to vocab-block 0, so each
    scores/probs block is flushed to HBM exactly once (after its pass-1
    write) -- no doubled output traffic.
    """
    p = pl.program_id(1)
    j = pl.program_id(2)

    logits = jnp.dot(x_ref[...], w_ref[...], preferred_element_type=jnp.float32)
    logits = logits + b_ref[...]                                 # (tm, tv) f32

    @pl.when(p == 0)
    def _pass0():
        @pl.when(j == 0)
        def _init():
            m_sc[...] = jnp.full(m_sc.shape, -jnp.inf, dtype=m_sc.dtype)
            s_sc[...] = jnp.zeros(s_sc.shape, dtype=s_sc.dtype)
            bestv_sc[...] = jnp.full(bestv_sc.shape, -jnp.inf, dtype=bestv_sc.dtype)
            besti_sc[...] = jnp.zeros(besti_sc.shape, dtype=besti_sc.dtype)

        # Mask vocab columns beyond V (ragged last vocab tile).
        col = j * tv + jax.lax.broadcasted_iota(jnp.int32, logits.shape, 1)
        lg = jnp.where(col < vocab, logits, -jnp.inf)

        tile_max = jnp.max(lg, axis=-1, keepdims=True)
        local_i = jnp.argmax(lg, axis=-1, keepdims=True).astype(jnp.int32)

        m_old = m_sc[...]
        m_new = jnp.maximum(m_old, tile_max)
        s_sc[...] = (s_sc[...] * jnp.exp(m_old - m_new)
                     + jnp.sum(jnp.exp(lg - m_new), axis=-1, keepdims=True))
        m_sc[...] = m_new

        # First-occurrence tie semantics: only strictly-greater replaces.
        take = tile_max > bestv_sc[...]
        besti_sc[...] = jnp.where(take, j * tv + local_i, besti_sc[...])
        bestv_sc[...] = jnp.where(take, tile_max, bestv_sc[...])

    @pl.when(p == 1)
    def _pass1():
        s = s_sc[...]
        shifted = logits - m_sc[...]
        e = jnp.exp(shifted)
        scores_ref[...] = (shifted - jnp.log(s)).astype(scores_ref.dtype)
        probs_ref[...] = (e * pl.reciprocal(s, approx=False)).astype(probs_ref.dtype)

        @pl.when(j == 0)
        def _preds():
            pred_ref[...] = jnp.broadcast_to(besti_sc[...], pred_ref.shape)


# ---------------------------------------------------------------------------
# Chip-aware sizing helpers
# ---------------------------------------------------------------------------

def _tpu_vmem_and_cores():
    """(per-TensorCore VMEM bytes, TensorCores per chip), with safe fallbacks."""
    vmem_cap = None
    cores = None
    try:
        get_info = getattr(pltpu, "get_tpu_info", None)
        if get_info is not None:
            info = get_info()
            for name in ("vmem_capacity_bytes", "vmem_bytes", "vmem_size_bytes"):
                val = getattr(info, name, None)
                if val:
                    vmem_cap = int(val)
                    break
            for name in ("num_tensorcores", "tensorcores_per_chip",
                         "num_cores", "core_count"):
                val = getattr(info, name, None)
                if val:
                    cores = int(val)
                    break
    except Exception:
        pass

    kind = ""
    try:
        kind = jax.devices()[0].device_kind.lower()
    except Exception:
        pass

    if vmem_cap is None:
        vmem_cap = 64 * _MIB if "v7" in kind else 128 * _MIB
    if "v7" in kind:                       # 64 MiB per TensorCore on v7x
        vmem_cap = min(vmem_cap, 64 * _MIB)
    vmem_cap = max(32 * _MIB, min(vmem_cap, 128 * _MIB))

    if cores is None:
        cores = 2 if any(t in kind for t in ("v7", "v4", "v5p")) else 1
    cores = max(1, min(cores, 2))
    return vmem_cap, cores


def _est_fast_bytes(tm, D, V, x_bytes, w_bytes, o_bytes):
    # Conservative: assume DOUBLE-buffered weight/bias so the Buffered(1)
    # fallback (default pipelining) also fits the same tm / limit.
    weight = 2 * D * V * w_bytes
    bias = 2 * _round_up(V, _LANE) * 4
    x_in = 2 * tm * D * x_bytes                 # double-buffered input tile
    outs = 2 * 2 * tm * V * o_bytes             # scores + probs, double-buffered
    preds = 2 * tm * _LANE * 4
    temps = 5 * tm * V * 4                      # logits/shifted, e, scores, probs, reduce
    return weight + bias + x_in + outs + preds + temps


def _est_tiled_bytes(tm, tv, D, x_bytes, w_bytes, o_bytes):
    weight = 2 * D * tv * w_bytes               # double-buffered weight column tile
    bias = 2 * tv * 4
    x_in = 2 * tm * D * x_bytes
    outs = 2 * 2 * tm * tv * o_bytes
    preds = 2 * tm * _LANE * 4
    temps = 5 * tm * tv * 4
    stats = 4 * tm * _LANE * 4                  # (tm,1) f32 scratch pads to (tm,128)
    return weight + bias + x_in + outs + preds + temps + stats


# ---------------------------------------------------------------------------
# pallas_call drivers
# ---------------------------------------------------------------------------

def _call_fast(x2d, weight, b2d, out_shape, M, D, V, tm_target,
               x_bytes, w_bytes, o_bytes, budget, vmem_limit_cap):
    # Largest MXU/store-friendly row tile that fits the budget; never drops
    # below 128 rows (or M itself when M is small).
    cands = sorted({c for c in (tm_target, 512, 384, 256, 128,
                                min(_MXU_ROWS, _round_up(M, 8)))
                    if c <= tm_target}, reverse=True)
    tm_eff = cands[-1]
    for c in cands:
        if _est_fast_bytes(c, D, V, x_bytes, w_bytes, o_bytes) <= budget:
            tm_eff = c
            break

    est = _est_fast_bytes(tm_eff, D, V, x_bytes, w_bytes, o_bytes)
    vmem_limit = int(min(vmem_limit_cap, max(32 * _MIB, 1.25 * est)))
    grid = (pl.cdiv(M, tm_eff),)

    out_specs = [
        pl.BlockSpec((tm_eff, V), lambda i: (i, 0)),
        pl.BlockSpec((tm_eff, V), lambda i: (i, 0)),
        pl.BlockSpec((tm_eff, _LANE), lambda i: (i, 0)),
    ]

    def run(single_buffer_weights):
        if single_buffer_weights:
            # Weight/bias block index never changes -> keep ONE resident copy.
            w_spec = pl.BlockSpec((D, V), lambda i: (0, 0),
                                  pipeline_mode=pl.Buffered(buffer_count=1))
            b_spec = pl.BlockSpec((1, V), lambda i: (0, 0),
                                  pipeline_mode=pl.Buffered(buffer_count=1))
        else:
            w_spec = pl.BlockSpec((D, V), lambda i: (0, 0))
            b_spec = pl.BlockSpec((1, V), lambda i: (0, 0))
        in_specs = [pl.BlockSpec((tm_eff, D), lambda i: (i, 0)), w_spec, b_spec]
        return pl.pallas_call(
            _generator_kernel,
            out_shape=out_shape,
            grid_spec=pltpu.PrefetchScalarGridSpec(
                num_scalar_prefetch=0, grid=grid,
                in_specs=in_specs, out_specs=out_specs),
            compiler_params=pltpu.CompilerParams(
                dimension_semantics=("parallel",),
                vmem_limit_bytes=vmem_limit),
        )(x2d, weight, b2d)

    try:
        return run(single_buffer_weights=True)
    except (TypeError, ValueError, NotImplementedError, pltpu.LoweringException):
        # pipeline_mode / Buffered(1) unsupported on this jax version; the
        # estimate above already assumed two weight buffers, so the default
        # double-buffered pipelining still fits the same tm / vmem limit.
        return run(single_buffer_weights=False)


def _call_vtiled(x2d, weight, b2d, out_shape, M, D, V, tm_target, tv_req,
                 x_bytes, w_bytes, o_bytes, budget, vmem_limit_cap):
    v_need = _round_up(V, _LANE)
    if tv_req is not None:
        tv_cands = [min(_round_up(tv_req, _LANE), v_need)]
    else:
        tv_cands = sorted({min(c, v_need)
                           for c in (4096, 2048, 1024, 512, 256, 128)},
                          reverse=True)
    tm_cands = sorted({c for c in (tm_target, 256, 128, 64, 32, 16, 8)
                       if c <= tm_target}, reverse=True)

    tm_eff, tv_eff = tm_cands[-1], tv_cands[-1]
    done = False
    for tmc in tm_cands:
        for tvc in tv_cands:
            if _est_tiled_bytes(tmc, tvc, D, x_bytes, w_bytes, o_bytes) <= budget:
                tm_eff, tv_eff = tmc, tvc
                done = True
                break
        if done:
            break

    est = _est_tiled_bytes(tm_eff, tv_eff, D, x_bytes, w_bytes, o_bytes)
    vmem_limit = int(min(vmem_limit_cap, max(32 * _MIB, 1.25 * est)))
    grid = (pl.cdiv(M, tm_eff), 2, pl.cdiv(V, tv_eff))

    kernel = functools.partial(_generator_vtiled_kernel, vocab=V, tv=tv_eff)

    in_specs = [
        pl.BlockSpec((tm_eff, D), lambda i, p, j: (i, 0)),
        pl.BlockSpec((D, tv_eff), lambda i, p, j: (0, j)),
        pl.BlockSpec((1, tv_eff), lambda i, p, j: (0, j)),
    ]
    # Pass-0 steps alias vocab-block 0 so each scores/probs block is flushed
    # exactly once, right after its pass-1 write.
    out_specs = [
        pl.BlockSpec((tm_eff, tv_eff), lambda i, p, j: (i, j * p)),
        pl.BlockSpec((tm_eff, tv_eff), lambda i, p, j: (i, j * p)),
        pl.BlockSpec((tm_eff, _LANE), lambda i, p, j: (i, 0)),
    ]
    scratch = [
        pltpu.VMEM((tm_eff, 1), jnp.float32),   # running max
        pltpu.VMEM((tm_eff, 1), jnp.float32),   # running sum(exp)
        pltpu.VMEM((tm_eff, 1), jnp.float32),   # best logit value
        pltpu.VMEM((tm_eff, 1), jnp.int32),     # best logit index (argmax)
    ]
    return pl.pallas_call(
        kernel,
        out_shape=out_shape,
        grid_spec=pltpu.PrefetchScalarGridSpec(
            num_scalar_prefetch=0, grid=grid,
            in_specs=in_specs, out_specs=out_specs,
            scratch_shapes=scratch),
        compiler_params=pltpu.CompilerParams(
            dimension_semantics=("parallel", "arbitrary", "arbitrary"),
            vmem_limit_bytes=vmem_limit),
    )(x2d, weight, b2d)


# ---------------------------------------------------------------------------
# Public wrapper (Generator.forward)
# ---------------------------------------------------------------------------

def generator_forward(inputs, weight, bias, *, tm=256, tv=None, out_dtype=None,
                      vmem_budget_bytes=None, force_vocab_tiling=False):
    """inputs: [B, S, D]; weight: [D, V]; bias: [V].

    Returns dict(probs, scores, predictions, source_dynamic_vocab_size,
    target_dynamic_vocab_size), matching Generator.forward.
    Pass out_dtype=jnp.bfloat16 to halve scores/probs HBM writeback when the
    caller tolerates bf16 outputs.
    """
    B, S, D = inputs.shape
    V = weight.shape[1]
    M = B * S
    if out_dtype is None:
        out_dtype = inputs.dtype

    x_bytes = jnp.dtype(inputs.dtype).itemsize
    w_bytes = jnp.dtype(weight.dtype).itemsize
    o_bytes = jnp.dtype(out_dtype).itemsize

    vmem_cap, n_cores = _tpu_vmem_and_cores()
    if vmem_budget_bytes is None:
        vmem_budget_bytes = int(vmem_cap * 0.78)     # ~100 MiB v5e/v6e, ~50 MiB v7x
    vmem_limit_cap = int(vmem_cap * 0.875)           # ~112 MiB v5e/v6e, ~56 MiB v7x

    x2d = inputs.reshape(M, D)
    b2d = bias.reshape(1, V).astype(jnp.float32)     # cast once in XLA, not per step

    # Row tile: MXU/store friendly, covers M with a ragged (masked) last tile.
    m_need = _round_up(M, 8)
    tm_target = min(_round_up(tm, 8), m_need)
    if n_cores >= 2 and M >= 2 * _MXU_ROWS:
        # 2-TensorCore chips: make sure both cores get >=128-row tiles.
        tm_target = min(tm_target,
                        max(_MXU_ROWS, _round_up(pl.cdiv(M, n_cores), _MXU_ROWS)))

    out_shape = (
        jax.ShapeDtypeStruct((M, V), out_dtype),        # scores
        jax.ShapeDtypeStruct((M, V), out_dtype),        # probs
        jax.ShapeDtypeStruct((M, _LANE), jnp.int32),    # predictions (lane-dense)
    )

    min_fast_tm = min(_MXU_ROWS, m_need)
    fast_fits = (_est_fast_bytes(min_fast_tm, D, V, x_bytes, w_bytes, o_bytes)
                 <= vmem_budget_bytes)

    if fast_fits and not force_vocab_tiling:
        scores, probs, preds = _call_fast(
            x2d, weight, b2d, out_shape, M, D, V, tm_target,
            x_bytes, w_bytes, o_bytes, vmem_budget_bytes, vmem_limit_cap)
    else:
        scores, probs, preds = _call_vtiled(
            x2d, weight, b2d, out_shape, M, D, V, tm_target, tv,
            x_bytes, w_bytes, o_bytes, vmem_budget_bytes, vmem_limit_cap)

    # TODO(synk): compute_loss (NLLLoss + Seq2SeqMetrics) is training-side
    # bookkeeping and is not implemented here (forward only).
    return dict(
        probs=probs.reshape(B, S, V),
        scores=scores.reshape(B, S, V),
        predictions=preds[:, 0].reshape(B, S),
        source_dynamic_vocab_size=0,
        target_dynamic_vocab_size=0,
    )


if __name__ == "__main__":
    # --- fast path (full-V block) -----------------------------------------
    B, S, D, V = 2, 8, 32, 128
    key = jax.random.PRNGKey(0)
    k_x, k_w, k_b = jax.random.split(key, 3)

    inputs = jax.random.normal(k_x, (B, S, D), dtype=jnp.float32)
    weight = jax.random.normal(k_w, (D, V), dtype=jnp.float32) * (1.0 / jnp.sqrt(D))
    bias = jax.random.normal(k_b, (V,), dtype=jnp.float32) * 0.01

    out = generator_forward(inputs, weight, bias)
    jax.block_until_ready(out["probs"])
    jax.block_until_ready(out["scores"])
    jax.block_until_ready(out["predictions"])

    logits_ref = inputs.reshape(B * S, D) @ weight + bias
    scores_ref = jax.nn.log_softmax(logits_ref, axis=-1).reshape(B, S, V)
    probs_ref = jax.nn.softmax(logits_ref, axis=-1).reshape(B, S, V)
    preds_ref = jnp.argmax(logits_ref, axis=-1).reshape(B, S)

    assert out["probs"].shape == (B, S, V)
    assert out["scores"].shape == (B, S, V)
    assert out["predictions"].shape == (B, S)
    assert jnp.allclose(out["scores"], scores_ref, atol=1e-4), "scores mismatch"
    assert jnp.allclose(out["probs"], probs_ref, atol=1e-5), "probs mismatch"
    assert jnp.array_equal(out["predictions"], preds_ref), "predictions mismatch"

    # --- vocab-tiled two-pass path (ragged rows + ragged vocab tile) -------
    B2, S2, D2, V2 = 2, 10, 32, 320
    k_x2, k_w2, k_b2 = jax.random.split(jax.random.PRNGKey(1), 3)
    inputs2 = jax.random.normal(k_x2, (B2, S2, D2), dtype=jnp.float32)
    weight2 = jax.random.normal(k_w2, (D2, V2), dtype=jnp.float32) * (1.0 / jnp.sqrt(D2))
    bias2 = jax.random.normal(k_b2, (V2,), dtype=jnp.float32) * 0.01

    out2 = generator_forward(inputs2, weight2, bias2,
                             force_vocab_tiling=True, tv=128)
    jax.block_until_ready(out2["probs"])

    logits2 = inputs2.reshape(B2 * S2, D2) @ weight2 + bias2
    scores2 = jax.nn.log_softmax(logits2, axis=-1).reshape(B2, S2, V2)
    probs2 = jax.nn.softmax(logits2, axis=-1).reshape(B2, S2, V2)
    preds2 = jnp.argmax(logits2, axis=-1).reshape(B2, S2)
    assert jnp.allclose(out2["scores"], scores2, atol=2e-4), "tiled scores mismatch"
    assert jnp.allclose(out2["probs"], probs2, atol=2e-5), "tiled probs mismatch"
    assert jnp.array_equal(out2["predictions"], preds2), "tiled predictions mismatch"

    # --- bf16 operands / bf16 outputs smoke run (MXU-native path) ----------
    out_bf16 = generator_forward(inputs.astype(jnp.bfloat16),
                                 weight.astype(jnp.bfloat16),
                                 bias.astype(jnp.bfloat16))
    jax.block_until_ready(out_bf16["probs"])
    row_sums = jnp.sum(out_bf16["probs"].astype(jnp.float32), axis=-1)
    assert jnp.allclose(row_sums, 1.0, atol=5e-2), "bf16 probs not normalized"

    print("KERNEL_OK")
</pallas_src>

<mosaic_0001>
module attributes {stable_mosaic.version = 11 : i64} {
  func.func @_generator_kernel(%arg0: i32, %arg1: memref<16x32xf32, #tpu.memory_space<vmem>>, %arg2: memref<32x128xf32, #tpu.memory_space<vmem>>, %arg3: memref<1x128xf32, #tpu.memory_space<vmem>>, %arg4: memref<16x128xf32, #tpu.memory_space<vmem>>, %arg5: memref<16x128xf32, #tpu.memory_space<vmem>>, %arg6: memref<16x128xi32, #tpu.memory_space<vmem>>) attributes {dimension_semantics = [#tpu.dimension_semantics<parallel>], iteration_bounds = array<i64: 1>, scalar_prefetch = 0 : i64, scratch_operands = 0 : i64, tpu.core_type = #tpu.core_type<tc>, window_params = [{transform_indices = @transform_0, window_bounds = array<i64: 16, 32>}, {pipeline_mode = #tpu.pipeline_mode<synchronous>, transform_indices = @transform_1, window_bounds = array<i64: 32, 128>}, {pipeline_mode = #tpu.pipeline_mode<synchronous>, transform_indices = @transform_2, window_bounds = array<i64: 1, 128>}, {transform_indices = @transform_3, window_bounds = array<i64: 16, 128>}, {transform_indices = @transform_4, window_bounds = array<i64: 16, 128>}, {transform_indices = @transform_5, window_bounds = array<i64: 16, 128>}]} {
    %c0 = arith.constant 0 : index
    %c0_0 = arith.constant 0 : index
    %0 = vector.load %arg1[%c0, %c0_0] : memref<16x32xf32, #tpu.memory_space<vmem>>, vector<16x32xf32>
    %c0_1 = arith.constant 0 : index
    %c0_2 = arith.constant 0 : index
    %1 = vector.load %arg2[%c0_1, %c0_2] : memref<32x128xf32, #tpu.memory_space<vmem>>, vector<32x128xf32>
    %cst = arith.constant dense<0.000000e+00> : vector<16x128xf32>
    %2 = tpu.matmul %0, %1, %cst {dimension_numbers = #tpu.dot_dimension_numbers<[1], [0], [0], [1], [0, 0, 1, 1], [], []>} : vector<16x32xf32>, vector<32x128xf32>, vector<16x128xf32> -> vector<16x128xf32>
    %c0_3 = arith.constant 0 : index
    %c0_4 = arith.constant 0 : index
    %3 = vector.load %arg3[%c0_3, %c0_4] : memref<1x128xf32, #tpu.memory_space<vmem>>, vector<1x128xf32>
    %4 = vector.broadcast %3 : vector<1x128xf32> to vector<16x128xf32>
    %5 = arith.addf %2, %4 : vector<16x128xf32>
    %6 = tpu.reduce_index %5 {axis = 1 : i32, kind = #tpu.reduction_kind<arg_max>} : vector<16x128xf32> -> vector<16xi32>
    %7 = vector.shape_cast %6 : vector<16xi32> to vector<16x1xi32>
    %cst_5 = arith.constant dense<0xFF800000> : vector<16xf32>
    %8 = vector.multi_reduction <maximumf>, %5, %cst_5 [1] : vector<16x128xf32> to vector<16xf32>
    %9 = vector.shape_cast %8 : vector<16xf32> to vector<16x1xf32>
    %10 = vector.broadcast %9 : vector<16x1xf32> to vector<16x128xf32>
    %11 = arith.subf %5, %10 : vector<16x128xf32>
    %12 = math.exp %11 : vector<16x128xf32>
    %cst_6 = arith.constant dense<0.000000e+00> : vector<16xf32>
    %13 = vector.multi_reduction <add>, %12, %cst_6 [1] : vector<16x128xf32> to vector<16xf32>
    %14 = vector.shape_cast %13 : vector<16xf32> to vector<16x1xf32>
    %15 = math.log %14 : vector<16x1xf32>
    %16 = vector.broadcast %15 : vector<16x1xf32> to vector<16x128xf32>
    %17 = arith.subf %11, %16 : vector<16x128xf32>
    %c0_7 = arith.constant 0 : index
    %c0_8 = arith.constant 0 : index
    %18 = vector.load %arg4[%c0_7, %c0_8] : memref<16x128xf32, #tpu.memory_space<vmem>>, vector<16x128xf32>
    tpu.vector_store %arg4[%c0_7, %c0_8], %17 {strides = array<i32>} : memref<16x128xf32, #tpu.memory_space<vmem>>, vector<16x128xf32>,
    %19 = tpu.reciprocal %14 : vector<16x1xf32> -> vector<16x1xf32>
    %20 = vector.broadcast %19 : vector<16x1xf32> to vector<16x128xf32>
    %21 = arith.mulf %12, %20 : vector<16x128xf32>
    %c0_9 = arith.constant 0 : index
    %c0_10 = arith.constant 0 : index
    %22 = vector.load %arg5[%c0_9, %c0_10] : memref<16x128xf32, #tpu.memory_space<vmem>>, vector<16x128xf32>
    tpu.vector_store %arg5[%c0_9, %c0_10], %21 {strides = array<i32>} : memref<16x128xf32, #tpu.memory_space<vmem>>, vector<16x128xf32>,
    %23 = vector.shape_cast %7 : vector<16x1xi32> to vector<16x1xi32>
    %24 = vector.broadcast %23 : vector<16x1xi32> to vector<16x128xi32>
    %c0_11 = arith.constant 0 : index
    %c0_12 = arith.constant 0 : index
    %25 = vector.load %arg6[%c0_11, %c0_12] : memref<16x128xi32, #tpu.memory_space<vmem>>, vector<16x128xi32>
    tpu.vector_store %arg6[%c0_11, %c0_12], %24 {strides = array<i32>} : memref<16x128xi32, #tpu.memory_space<vmem>>, vector<16x128xi32>,
    return
  }
  func.func @transform_0(%arg0: i32) -> (i32, i32) {
    %c0_i32 = arith.constant 0 : i32
    %c0_i32_0 = arith.constant 0 : i32
    return %arg0, %c0_i32 : i32, i32
  }
  func.func @transform_1(%arg0: i32) -> (i32, i32) {
    %c0_i32 = arith.constant 0 : i32
    %c0_i32_0 = arith.constant 0 : i32
    %c0_i32_1 = arith.constant 0 : i32
    return %c0_i32, %c0_i32_0 : i32, i32
  }
  func.func @transform_2(%arg0: i32) -> (i32, i32) {
    %c0_i32 = arith.constant 0 : i32
    %c0_i32_0 = arith.constant 0 : i32
    %c0_i32_1 = arith.constant 0 : i32
    return %c0_i32, %c0_i32_0 : i32, i32
  }
  func.func @transform_3(%arg0: i32) -> (i32, i32) {
    %c0_i32 = arith.constant 0 : i32
    %c0_i32_0 = arith.constant 0 : i32
    return %arg0, %c0_i32 : i32, i32
  }
  func.func @transform_4(%arg0: i32) -> (i32, i32) {
    %c0_i32 = arith.constant 0 : i32
    %c0_i32_0 = arith.constant 0 : i32
    return %arg0, %c0_i32 : i32, i32
  }
  func.func @transform_5(%arg0: i32) -> (i32, i32) {
    %c0_i32 = arith.constant 0 : i32
    %c0_i32_0 = arith.constant 0 : i32
    return %arg0, %c0_i32 : i32, i32
  }
}

</mosaic_0001>

<bundles_post_ra>
// kernel: tpu_custom_call.1
= control target key start
LH: loop header
LB: loop body
LE: loop exit
PB: predicated region body
PF: predicated region fallthrough
CT: control target
= control target key end

     0   :  { %11 = vsyncpa [#allocation3], 0  ;;  %s430_s0 = inlined_call_operand.hbm [shape: f32[16,32], index: 0, kind: input, shape index: {}]   ;;  %s431_s1 = inlined_call_operand.hbm [shape: f32[32,128], index: 1, kind: input, shape index: {}]   ;;  %s432_s2 = inlined_call_operand.vmem [shape: f32[1,128], index: 2, kind: input, shape index: {}]   ;;  %s433_s3 = inlined_call_operand.hbm [shape: f32[16,128], index: 3, kind: output, shape index: {0}]   ;;  %s434_s4 = inlined_call_operand.hbm [shape: f32[16,128], index: 4, kind: output, shape index: {1}]   ;;  %s435_s5 = inlined_call_operand.hbm [shape: s32[16,128], index: 5, kind: output, shape index: {2}]  }
   0x1   :  { %12 = vsyncpa [#allocation6], 0 }
   0x2   :  { %13 = vsyncpa [#allocation4], 0 }
   0x3   :  { %14 = vsyncpa [#allocation9], 0  ;;  %s19_s20 = sshll.u32 %s430_s0, 4  ;;  %s360_s21 = smov [#allocation2]   ;;  %s20_s20 = int_to_ptr.hbm [resolvable:$true] %s19_s20 }
   0x4   :  { %s21_s22 = sshll.u32 %s360_s21, 4  ;;  %s32_s25 = sshll.u32 %s431_s1, 4  ;;  %s22_s22 = int_to_ptr.vmem [resolvable:$true] %s21_s22  ;;  %s33_s25 = int_to_ptr.hbm [resolvable:$true] %s32_s25 }
   0x5   :  { %s361_s26 = smov 128   ;;  %s362_s27 = smov 8  }
   0x6   :  { %27 = dma.hbm_to_vmem [thread:$0]  %s20_s20, 256, %s22_s22, [#allocation3], %s361_s26, %s361_s26, %s362_s27  }
   0x7   :  { %s363_s28 = smov [#allocation5]  }
   0x8   :  { %s34_s29 = sshll.u32 %s363_s28, 4  ;;  %s35_s29 = int_to_ptr.vmem [resolvable:$true] %s34_s29 }
   0x9   :  { %40 = dma.hbm_to_vmem [thread:$0]  %s33_s25, 512, %s35_s29, [#allocation6], %s361_s26, %s361_s26, %s362_s27  }
   0xa   :  { %352 = dma.done.wait [#allocation3], 256  }
   0xb   :  { %353 = vsyncadd [#allocation3], 4294967040 }
   0xc   :  { %354 = dma.done.wait [#allocation6], 512  }
   0xd   :  { %355 = vsyncadd [#allocation6], 4294966784  ;;  %v56_v0 = vld [vmem:[#allocation5 + $0x18] sm:$0xff]  ;;  %v55_v1 = vld [vmem:[#allocation5 + $0x10] sm:$0xff]  ;;  %vm61_vm0 = vcmask 261120   ;;  %s157_s8 = sshll.u32 %s433_s3, 4  ;;  %s158_s8 = int_to_ptr.hbm [resolvable:$true] %s157_s8 }
   0xe   :  { %80 = vmatpush.msra.mxu0 %v56_v0  ;;  %208 = vmatpush.msra.mxu1 %v56_v0  ;;  %v54_v2 = vld [vmem:[#allocation5 + $0x8] sm:$0xff]  ;;  %v53_v3 = vld [vmem:[#allocation5] sm:$0xff]  ;;  %v51_v4 = vld [vmem:[#allocation2] sm:$0xff]  ;;  %s365_s3 = smov [#allocation8]   ;;  %s170_s12 = sshll.u32 %s434_s4, 4  ;;  %s171_s12 = int_to_ptr.hbm [resolvable:$true] %s170_s12 }
   0xf   :  { %v52_v5 = vld [vmem:[#allocation2 + $0x8] sm:$0xff]  ;;  %v219_v6 = vld [vmem:[%s432_s2] ss:$0 sm:$0xff]  ;;  %s364_s2 = smov [#allocation7]   ;;  %s168_s9 = sshll.u32 %s365_s3, 4  ;;  %s169_s9 = int_to_ptr.vmem [resolvable:$true] %s168_s9 }
  0x10   :  { %81 = vmatpush.msra.mxu0 %v55_v1  ;;  %209 = vmatpush.msra.mxu1 %v55_v1  ;;  %s155_s30 = sshll.u32 %s364_s2, 4  ;;  %s366_s13 = smov [#allocation10]   ;;  %s156_s30 = int_to_ptr.vmem [resolvable:$true] %s155_s30 }
  0x11   :  { %s181_s14 = sshll.u32 %s366_s13, 4  ;;  %s183_s17 = sshll.u32 %s435_s5, 4  ;;  %s182_s14 = int_to_ptr.vmem [resolvable:$true] %s181_s14  ;;  %s184_s17 = int_to_ptr.hbm [resolvable:$true] %s183_s17 }
  0x12   :  { %82 = vmatpush.msra.mxu0 %v54_v2  ;;  %210 = vmatpush.msra.mxu1 %v54_v2 }
  0x14   :  { %83 = vmatpush.msra.mxu0 %v53_v3  ;;  %211 = vmatpush.msra.mxu1 %v53_v3 }
  0x15   :  { %206 = vmatmul.msk.f32.vlgmr.msra.gmra.mxu0 %vm61_vm0, %v51_v4  ;;  %207 = vmatmul.msk.f32.vlgmr.msra.gmra.mxu1 %vm61_vm0, %v52_v5 }
  0x92   :  { %v85_v7 = vpop.f32.mrf.mxu0  ;;  %v88_v9 = vpop.f32.mrf.mxu1 }
  0x93   :  { %v86_v8 = vadd.f32 %v219_v6, %v85_v7  ;;  %v89_v10 = vadd.f32 %v219_v6, %v88_v9 }
  0x95   :  { %91 = vmax.index.xlane.f32.xlu2 %v86_v8  ;;  %95 = vmax.xlane.f32.xlu0 %v86_v8 }
  0x9d   :  { %93 = vmax.index.xlane.f32.xlu2 %v89_v10  ;;  %97 = vmax.xlane.f32.xlu0 %v89_v10 }
 0x108   :  { %v92_v11 = vpop.xlane.xlu2 %91  ;;  %v96_v12 = vpop.xlane.xlu0 %95 }
 0x109   :  { %149 = vst [vmem:[#allocation10] sm:$0xff] %v92_v11  ;;  %v99_v13 = vsub.f32 %v86_v8, %v96_v12 }
 0x10b   :  { %v101_v14 = vmul.f32 1.442695, %v99_v13 }
 0x10d   :  { %220 = vpow2.f32 %v101_v14 }
 0x110   :  { %v94_v15 = vpop.xlane.xlu2 %93  ;;  %v98_v16 = vpop.xlane.xlu0 %97 }
 0x111   :  { %150 = vst [vmem:[#allocation10 + $0x8] sm:$0xff] %v94_v15  ;;  %v100_v17 = vsub.f32 %v89_v10, %v98_v16 }
 0x113   :  { %v221_v18 = vpop.eup %220  ;;  %v103_v19 = vmul.f32 1.442695, %v100_v17 }
 0x114   :  { %105 = vadd.xlane.f32.xlu1 %v221_v18 }
 0x115   :  { %222 = vpow2.f32 %v103_v19 }
 0x11b   :  { %v223_v20 = vpop.eup %222 }
 0x11c   :  { %107 = vadd.xlane.f32.xlu1 %v223_v20 }
 0x187   :  { %v106_v21 = vpop.xlane.xlu1 %105 }
 0x188   :  { %224 = vrcp.f32 %v106_v21  ;;  %v128_v28 = vand.u32 2147483648, %v106_v21  ;;  %v126_v30 = vand.u32 2147483647, %v106_v21  ;;  %vm122_vm2 = vweird.f32 %v106_v21 }
 0x189   :  { %226 = vlog2.f32 %v106_v21 }
 0x18a   :  { %v129_v34 = vor.u32 1.1754944e-38, %v128_v28  ;;  %vm127_vm4 = vcmp.eq.f32.partialorder %v126_v30, 8.507059e+37 }
 0x18e   :  { %v225_v22 = vpop.eup %224 }
 0x18f   :  { %v227_v23 = vpop.eup %226  ;;  %v118_v24 = vmul.f32 %v225_v22, %v106_v21  ;;  %v108_v25 = vpop.xlane.xlu1 %107  ;;  %vm123_vm1 = vweird.f32 %v225_v22 }
 0x190   :  { %228 = vlog2.f32 %v108_v25  ;;  %v110_v27 = vmul.f32 0.6931472, %v227_v23  ;;  %vm124_vm3 = vmor %vm122_vm2, %vm123_vm1  ;;  %v142_v43 = vand.u32 2147483648, %v108_v25  ;;  %v140_v45 = vand.u32 2147483647, %v108_v25 }
 0x191   :  { %v119_v26 = vsub.f32 1.0, %v118_v24  ;;  %230 = vrcp.f32 %v108_v25  ;;  %vm136_vm6 = vweird.f32 %v108_v25 }
 0x192   :  { %v113_v31 = vsub.f32 %v99_v13, %v110_v27  ;;  %v143_v47 = vor.u32 1.1754944e-38, %v142_v43  ;;  %vm141_vm8 = vcmp.eq.f32.partialorder %v140_v45, 8.507059e+37 }
 0x193   :  { %v120_v29 = vmul.f32 %v225_v22, %v119_v26 }
 0x194   :  { %115 = vst [vmem:[#allocation7] sm:$0xff] %v113_v31 }
 0x195   :  { %v121_v32 = vadd.f32 %v225_v22, %v120_v29 }
 0x196   :  { %v229_v33 = vpop.eup %228 }
 0x197   :  { %v231_v35 = vpop.eup %230  ;;  %v125_v36 = vsel %vm124_vm3, %v225_v22, %v121_v32  ;;  %v112_v37 = vmul.f32 0.6931472, %v229_v33 }
 0x198   :  { %v132_v38 = vmul.f32 %v231_v35, %v108_v25  ;;  %v130_v39 = vsel %vm127_vm4, %v129_v34, %v125_v36  ;;  %vm137_vm5 = vweird.f32 %v231_v35 }
 0x199   :  { %v145_v40 = vmul.f32 %v221_v18, %v130_v39  ;;  %v114_v41 = vsub.f32 %v100_v17, %v112_v37  ;;  %vm138_vm7 = vmor %vm136_vm6, %vm137_vm5 }
 0x19a   :  { %v133_v42 = vsub.f32 1.0, %v132_v38 }
 0x19b   :  { %147 = vst [vmem:[#allocation8] sm:$0xff] %v145_v40 }
 0x19c   :  { %v134_v44 = vmul.f32 %v231_v35, %v133_v42  ;;  %116 = vst [vmem:[#allocation7 + $0x8] sm:$0xff] %v114_v41 }
 0x19d   :  { %163 = dma.vmem_to_hbm [thread:$0]  %s156_s30, 256, %s158_s8, [#allocation4], %s361_s26, %s361_s26, %s362_s27  }
 0x19e   :  { %v135_v46 = vadd.f32 %v231_v35, %v134_v44 }
 0x1a0   :  { %v139_v48 = vsel %vm138_vm7, %v231_v35, %v135_v46 }
 0x1a1   :  { %v144_v49 = vsel %vm141_vm8, %v143_v47, %v139_v48 }
 0x1a2   :  { %v146_v50 = vmul.f32 %v223_v20, %v144_v49 }
 0x1a4   :  { %148 = vst [vmem:[#allocation8 + $0x8] sm:$0xff] %v146_v50 }
 0x1a5   :  { %176 = dma.vmem_to_hbm [thread:$0]  %s169_s9, 256, %s171_s12, [#allocation9], %s361_s26, %s361_s26, %s362_s27  }
 0x1a6   :  { %189 = dma.vmem_to_hbm [thread:$0]  %s182_s14, 256, %s184_s17, [#allocation9], %s361_s26, %s361_s26, %s362_s27  }
 0x1a7   :  { %356 = dma.done.wait [#allocation4], 256  }
 0x1a8   :  { %357 = vsyncadd [#allocation4], 4294967040 }
 0x1a9   :  { %358 = dma.done.wait [#allocation9], 512  }
 0x1aa   :  { %359 = vsyncadd [#allocation9], 4294966784 }
 0x1ab   :  { %202 = vsyncpa [#allocation3], 1 }
 0x1ac   :  { %203 = vsyncpa [#allocation6], 1 }
 0x1ad   :  { %204 = vsyncpa [#allocation4], 1 }
 0x1ae   :  { %205 = vsyncpa [#allocation9], 1 }

</bundles_post_ra>
